<compile_context>
chip_gen: v5e
topology: v5e:2x2
jax: 0.10.0
libtpu: 0.0.40
codegen_flags: <defaults>
</compile_context>

<pallas_src>
import functools

import jax
import jax.numpy as jnp
from jax.experimental import pallas as pl
from jax.experimental.pallas import tpu as pltpu

_MIB = 1024 * 1024


# ----------------------------------------------------------------------------
# Kernels
# ----------------------------------------------------------------------------
def _swiglu_kernel_acc(x_ref, wg_ref, wu_ref, w2_ref, o_ref, acc_ref):
    """Reduction over the intermediate dim I with an f32 VMEM accumulator."""
    # x_ref  : (tm, H)   tile of input rows (resident across the I axis)
    # wg_ref : (H, ti)   gate-projection weight tile   (first half of w1)
    # wu_ref : (H, ti)   up-projection weight tile     (second half of w1)
    # w2_ref : (ti, H)   down-projection weight tile
    # o_ref  : (tm, H)   output tile
    # acc_ref: (tm, H)   f32 accumulator scratch (persists across the I axis)
    j = pl.program_id(1)

    @pl.when(j == 0)
    def _():
        acc_ref[...] = jnp.zeros_like(acc_ref)

    x = x_ref[...]

    # fc1 as two MXU dots (no fused [tm, 2I] intermediate, no result slicing).
    g = jnp.dot(x, wg_ref[...], preferred_element_type=jnp.float32)
    u = jnp.dot(x, wu_ref[...], preferred_element_type=jnp.float32)

    # silu(g) * u in f32 (VPU + EUP); cast only for the fc2 MXU operand.
    gated = g * jax.nn.sigmoid(g) * u

    # fc2 partial sum: [tm, ti] @ [ti, H] -> accumulate into f32 scratch.
    acc_ref[...] += jnp.dot(gated.astype(w2_ref.dtype), w2_ref[...],
                            preferred_element_type=jnp.float32)

    @pl.when(j == pl.num_programs(1) - 1)
    def _():
        o_ref[...] = acc_ref[...].astype(o_ref.dtype)


def _swiglu_kernel_single(x_ref, wg_ref, wu_ref, w2_ref, o_ref):
    """Fully-resident-weight path (ti == I): no accumulator scratch needed."""
    x = x_ref[...]
    g = jnp.dot(x, wg_ref[...], preferred_element_type=jnp.float32)
    u = jnp.dot(x, wu_ref[...], preferred_element_type=jnp.float32)
    gated = g * jax.nn.sigmoid(g) * u
    o_ref[...] = jnp.dot(gated.astype(w2_ref.dtype), w2_ref[...],
                         preferred_element_type=jnp.float32).astype(o_ref.dtype)


# ----------------------------------------------------------------------------
# Generation-aware configuration
# ----------------------------------------------------------------------------
@functools.lru_cache(maxsize=1)
def _chip_defaults():
    """Pick block_m / ti alignment / VMEM budget per TPU generation."""
    kind = ""
    try:
        kind = jax.devices()[0].device_kind.lower()
    except Exception:  # pragma: no cover - defensive
        pass

    vmem_cap = None
    try:
        vmem_cap = int(pltpu.get_tpu_info().vmem_capacity_bytes)
    except Exception:  # pragma: no cover - defensive
        vmem_cap = None

    is_v7 = ("7x" in kind) or ("v7" in kind)
    is_v6 = "v6" in kind
    is_v5e = ("v5e" in kind) or ("v5 lite" in kind) or ("v5lite" in kind)

    if is_v7:
        # 64 MiB VMEM per TensorCore, 2 TCs/chip, roofline knee ~620 flop/B.
        cap = vmem_cap or 64 * _MIB
        return dict(block_m=512, ti_align=256, num_cores=2,
                    budget_bytes=min(int(cap * 0.70), 44 * _MIB),
                    vmem_limit_bytes=min(int(cap * 0.875), 56 * _MIB))
    if is_v6:
        # 128 MiB VMEM, knee ~650 flop/B -> large row tile to cut weight traffic.
        cap = vmem_cap or 128 * _MIB
        return dict(block_m=1024, ti_align=256, num_cores=1,
                    budget_bytes=min(int(cap * 0.75), 96 * _MIB),
                    vmem_limit_bytes=min(int(cap * 0.875), 112 * _MIB))
    if is_v5e:
        # 128 MiB VMEM, knee ~240 flop/B -> tm=256 suffices; keep ti large so
        # small/medium weight sets stay fully resident (DMA'd once).
        cap = vmem_cap or 128 * _MIB
        return dict(block_m=256, ti_align=128, num_cores=1,
                    budget_bytes=min(int(cap * 0.75), 96 * _MIB),
                    vmem_limit_bytes=min(int(cap * 0.875), 112 * _MIB))

    # Unknown generation (or interpret mode): conservative one-size budget.
    cap = vmem_cap or 64 * _MIB
    return dict(block_m=256, ti_align=128, num_cores=1,
                budget_bytes=min(int(cap * 0.60), 40 * _MIB),
                vmem_limit_bytes=min(int(cap * 0.75), 48 * _MIB))


def _choose_tiles(m, hidden, inter, x_itemsize, w_itemsize,
                  block_m, ti_align, budget_bytes):
    """Pick (tm, ti): largest lane-aligned tiles fitting the VMEM budget."""

    def vmem_need(tm, ti):
        w_tiles = 3 * hidden * ti * w_itemsize * 2      # wg+wu+w2, double-buffered
        xo_tiles = 2 * tm * hidden * x_itemsize * 2     # x + out, double-buffered
        acc = tm * hidden * 4                           # f32 accumulator (conservative)
        live = 3 * tm * ti * 4                          # g, u, gated live f32 values
        return w_tiles + xo_tiles + acc + live

    def shrink_ti(tm):
        ti = inter
        # Only shrink along halvings that stay ti_align-aligned (lane/MXU
        # cadence) and that still divide `inter` (exact reduction tiling).
        while (vmem_need(tm, ti) > budget_bytes and ti % 2 == 0
               and (ti // 2) % ti_align == 0):
            ti //= 2
        return ti

    tm = m if m <= block_m else block_m
    ti = shrink_ti(tm)
    # If even the smallest aligned ti overflows, trade row-tile size down.
    while vmem_need(tm, ti) > budget_bytes and tm > 256 and tm % 16 == 0:
        tm //= 2
        ti = shrink_ti(tm)
    return tm, ti


# ----------------------------------------------------------------------------
# Public wrapper
# ----------------------------------------------------------------------------
@functools.partial(jax.jit, static_argnames=("block_m", "block_i"))
def swiglu_pallas(x, w1, w2, *, block_m=None, block_i=None):
    """x: [bs, seq, H]; w1: [H, 2I]; w2: [I, H] -> [bs, seq, H]."""
    bs, seq, hidden = x.shape
    inter = w2.shape[0]
    assert w1.shape == (hidden, 2 * inter)
    assert w2.shape == (inter, hidden)

    cfg = _chip_defaults()
    if block_m is None:
        block_m = cfg["block_m"]
    assert block_m % 8 == 0

    m = bs * seq
    x2d = x.reshape(m, hidden)

    x_isz = jnp.dtype(x.dtype).itemsize
    w_isz = jnp.dtype(w1.dtype).itemsize

    if block_i is None:
        tm, ti = _choose_tiles(m, hidden, inter, x_isz, w_isz,
                               block_m, cfg["ti_align"], cfg["budget_bytes"])
    else:
        tm = m if m <= block_m else block_m
        ti = block_i
    assert inter % ti == 0
    assert ti == inter or ti % 128 == 0
    # TODO(synk): for best perf, hidden and inter should be multiples of 128
    # (lane-dense tiles); small demo shapes rely on full-array blocks instead.

    # v7x megacore balance: give both TensorCores a row tile when M is large
    # enough but would otherwise land in a single grid step.
    if cfg["num_cores"] > 1 and m > 256 and pl.cdiv(m, tm) == 1:
        tm = ((-(-m // cfg["num_cores"])) + 7) // 8 * 8

    n_i = inter // ti
    grid = (pl.cdiv(m, tm), n_i)

    # Gate/up halves of w1.  Hot path: pass w1 twice (aliased, zero-copy) and
    # select the halves purely via the BlockSpec index_map.  Fallback (only
    # when the half boundary is not lane-aligned, i.e. I % 128 != 0 => tiny
    # shapes with ti == I): slice once here.
    if ti % 128 == 0:
        wg_arg, wu_arg = w1, w1
        half_off = inter // ti
        wg_map = lambda i, j: (0, j)
        wu_map = lambda i, j: (0, j + half_off)
    else:
        # TODO(synk): store gate/up pre-split (or pad I to a multiple of 128)
        # at init so this per-call slice never happens in production.
        wg_arg, wu_arg = w1[:, :inter], w1[:, inter:]
        wg_map = lambda i, j: (0, j)
        wu_map = lambda i, j: (0, j)

    in_specs = [
        pl.BlockSpec((tm, hidden), lambda i, j: (i, 0)),   # x rows (resident over I)
        pl.BlockSpec((hidden, ti), wg_map),                # gate weights
        pl.BlockSpec((hidden, ti), wu_map),                # up weights
        pl.BlockSpec((ti, hidden), lambda i, j: (j, 0)),   # down weights
    ]
    out_spec = pl.BlockSpec((tm, hidden), lambda i, j: (i, 0))

    if n_i == 1:
        kernel = _swiglu_kernel_single
        scratch_shapes = []
    else:
        kernel = _swiglu_kernel_acc
        scratch_shapes = [pltpu.VMEM((tm, hidden), jnp.float32)]

    # Cost model: weights are re-streamed once per row tile; activations are
    # read once and the output written once.
    n_row_tiles = pl.cdiv(m, tm)
    flops = 6 * m * hidden * inter               # 2*M*H*2I (fc1) + 2*M*I*H (fc2)
    bytes_accessed = (n_row_tiles * 3 * hidden * inter * w_isz
                      + 2 * m * hidden * x_isz)
    cost = pl.CostEstimate(flops=flops, transcendentals=m * inter,
                           bytes_accessed=bytes_accessed)

    out2d = pl.pallas_call(
        kernel,
        out_shape=jax.ShapeDtypeStruct((m, hidden), x.dtype),
        grid_spec=pltpu.PrefetchScalarGridSpec(
            num_scalar_prefetch=0,
            grid=grid,
            in_specs=in_specs,
            out_specs=out_spec,
            scratch_shapes=scratch_shapes,
        ),
        compiler_params=pltpu.CompilerParams(
            dimension_semantics=("parallel", "arbitrary"),
            vmem_limit_bytes=cfg["vmem_limit_bytes"],
        ),
        cost_estimate=cost,
    )(x2d, wg_arg, wu_arg, w2)

    return out2d.reshape(bs, seq, hidden)


def swiglu_reference(x, w1, w2):
    """Pure-JAX reference matching the PyTorch forward (f32 math)."""
    h = jnp.einsum("bsh,hk->bsk", x.astype(jnp.float32), w1.astype(jnp.float32))
    inter = w2.shape[0]
    x1, x3 = h[..., :inter], h[..., inter:]
    gated = x1 * jax.nn.sigmoid(x1) * x3
    return jnp.einsum("bsi,ih->bsh", gated, w2.astype(jnp.float32))


if __name__ == "__main__":
    key = jax.random.PRNGKey(0)
    kx, k1, k2, k3, k4, k5 = jax.random.split(key, 6)

    # ---- Small demo shapes (unaligned I, exercises the fallback split) ----
    bs, seq, hidden, inter = 2, 8, 32, 64
    x = jax.random.normal(kx, (bs, seq, hidden), dtype=jnp.float32)
    # Shapes from nn.Linear(hidden, 2*inter) / nn.Linear(inter, hidden),
    # stored transposed for right-multiply.
    w1 = jax.random.normal(k1, (hidden, 2 * inter), dtype=jnp.float32) * 0.05
    w2 = jax.random.normal(k2, (inter, hidden), dtype=jnp.float32) * 0.05

    out = jax.block_until_ready(swiglu_pallas(x, w1, w2))
    ref = swiglu_reference(x, w1, w2)
    assert out.shape == (bs, seq, hidden)
    assert jnp.allclose(out, ref, atol=1e-4, rtol=1e-4), "f32 mismatch vs reference"

    # bf16 path (MXU-friendly operands; looser tolerance for bf16 rounding).
    x_bf, w1_bf, w2_bf = (x.astype(jnp.bfloat16), w1.astype(jnp.bfloat16),
                          w2.astype(jnp.bfloat16))
    out_bf = jax.block_until_ready(swiglu_pallas(x_bf, w1_bf, w2_bf))
    ref_bf = swiglu_reference(x_bf, w1_bf, w2_bf)
    assert out_bf.shape == (bs, seq, hidden)
    assert jnp.allclose(out_bf.astype(jnp.float32), ref_bf,
                        atol=5e-2, rtol=1e-1), "bf16 mismatch vs reference"

    # ---- Lane-aligned shapes: zero-copy gate/up split via index_map, and a
    #      forced I-axis reduction (block_i) exercising the accumulator path.
    bs2, seq2, hidden2, inter2 = 2, 128, 256, 512
    x2 = jax.random.normal(k3, (bs2, seq2, hidden2), dtype=jnp.float32)
    w1b = jax.random.normal(k4, (hidden2, 2 * inter2), dtype=jnp.float32) * 0.02
    w2b = jax.random.normal(k5, (inter2, hidden2), dtype=jnp.float32) * 0.02

    ref2 = swiglu_reference(x2, w1b, w2b)
    out2 = jax.block_until_ready(swiglu_pallas(x2, w1b, w2b))
    assert jnp.allclose(out2, ref2, atol=2e-3, rtol=2e-3), "aligned f32 mismatch"

    out3 = jax.block_until_ready(swiglu_pallas(x2, w1b, w2b, block_i=256))
    assert jnp.allclose(out3, ref2, atol=2e-3, rtol=2e-3), "accumulator path mismatch"

    print("KERNEL_OK")
</pallas_src>

<mosaic_0001>
module attributes {stable_mosaic.version = 11 : i64} {
  func.func @_swiglu_kernel_single(%arg0: i32, %arg1: i32, %arg2: memref<16x32xf32, #tpu.memory_space<vmem>>, %arg3: memref<32x64xf32, #tpu.memory_space<vmem>>, %arg4: memref<32x64xf32, #tpu.memory_space<vmem>>, %arg5: memref<64x32xf32, #tpu.memory_space<vmem>>, %arg6: memref<16x32xf32, #tpu.memory_space<vmem>>) attributes {dimension_semantics = [#tpu.dimension_semantics<parallel>, #tpu.dimension_semantics<arbitrary>], iteration_bounds = array<i64: 1, 1>, scalar_prefetch = 0 : i64, scratch_operands = 0 : i64, tpu.core_type = #tpu.core_type<tc>, window_params = [{transform_indices = @transform_0, window_bounds = array<i64: 16, 32>}, {transform_indices = @transform_1, window_bounds = array<i64: 32, 64>}, {transform_indices = @transform_2, window_bounds = array<i64: 32, 64>}, {transform_indices = @transform_3, window_bounds = array<i64: 64, 32>}, {transform_indices = @transform_4, window_bounds = array<i64: 16, 32>}]} {
    %c0 = arith.constant 0 : index
    %c0_0 = arith.constant 0 : index
    %0 = vector.load %arg2[%c0, %c0_0] : memref<16x32xf32, #tpu.memory_space<vmem>>, vector<16x32xf32>
    %c0_1 = arith.constant 0 : index
    %c0_2 = arith.constant 0 : index
    %1 = vector.load %arg3[%c0_1, %c0_2] : memref<32x64xf32, #tpu.memory_space<vmem>>, vector<32x64xf32>
    %cst = arith.constant dense<0.000000e+00> : vector<16x64xf32>
    %2 = tpu.matmul %0, %1, %cst {dimension_numbers = #tpu.dot_dimension_numbers<[1], [0], [0], [1], [0, 0, 1, 1], [], []>} : vector<16x32xf32>, vector<32x64xf32>, vector<16x64xf32> -> vector<16x64xf32>
    %c0_3 = arith.constant 0 : index
    %c0_4 = arith.constant 0 : index
    %3 = vector.load %arg4[%c0_3, %c0_4] : memref<32x64xf32, #tpu.memory_space<vmem>>, vector<32x64xf32>
    %cst_5 = arith.constant dense<0.000000e+00> : vector<16x64xf32>
    %4 = tpu.matmul %0, %3, %cst_5 {dimension_numbers = #tpu.dot_dimension_numbers<[1], [0], [0], [1], [0, 0, 1, 1], [], []>} : vector<16x32xf32>, vector<32x64xf32>, vector<16x64xf32> -> vector<16x64xf32>
    %5 = arith.negf %2 : vector<16x64xf32>
    %6 = math.exp %5 : vector<16x64xf32>
    %cst_6 = arith.constant 1.000000e+00 : f32
    %7 = vector.broadcast %cst_6 : f32 to vector<16x64xf32>
    %8 = arith.addf %7, %6 : vector<16x64xf32>
    %9 = arith.divf %7, %8 : vector<16x64xf32>
    %10 = arith.mulf %2, %9 : vector<16x64xf32>
    %11 = arith.mulf %10, %4 : vector<16x64xf32>
    %c0_7 = arith.constant 0 : index
    %c0_8 = arith.constant 0 : index
    %12 = vector.load %arg5[%c0_7, %c0_8] : memref<64x32xf32, #tpu.memory_space<vmem>>, vector<64x32xf32>
    %cst_9 = arith.constant dense<0.000000e+00> : vector<16x32xf32>
    %13 = tpu.matmul %11, %12, %cst_9 {dimension_numbers = #tpu.dot_dimension_numbers<[1], [0], [0], [1], [0, 0, 1, 1], [], []>} : vector<16x64xf32>, vector<64x32xf32>, vector<16x32xf32> -> vector<16x32xf32>
    %c0_10 = arith.constant 0 : index
    %c0_11 = arith.constant 0 : index
    %14 = vector.load %arg6[%c0_10, %c0_11] : memref<16x32xf32, #tpu.memory_space<vmem>>, vector<16x32xf32>
    tpu.vector_store %arg6[%c0_10, %c0_11], %13 {strides = array<i32>} : memref<16x32xf32, #tpu.memory_space<vmem>>, vector<16x32xf32>,
    return
  }
  func.func @transform_0(%arg0: i32, %arg1: i32) -> (i32, i32) {
    %c0_i32 = arith.constant 0 : i32
    %c0_i32_0 = arith.constant 0 : i32
    return %arg0, %c0_i32 : i32, i32
  }
  func.func @transform_1(%arg0: i32, %arg1: i32) -> (i32, i32) {
    %c0_i32 = arith.constant 0 : i32
    %c0_i32_0 = arith.constant 0 : i32
    return %c0_i32, %arg1 : i32, i32
  }
  func.func @transform_2(%arg0: i32, %arg1: i32) -> (i32, i32) {
    %c0_i32 = arith.constant 0 : i32
    %c0_i32_0 = arith.constant 0 : i32
    return %c0_i32, %arg1 : i32, i32
  }
  func.func @transform_3(%arg0: i32, %arg1: i32) -> (i32, i32) {
    %c0_i32 = arith.constant 0 : i32
    %c0_i32_0 = arith.constant 0 : i32
    return %arg1, %c0_i32 : i32, i32
  }
  func.func @transform_4(%arg0: i32, %arg1: i32) -> (i32, i32) {
    %c0_i32 = arith.constant 0 : i32
    %c0_i32_0 = arith.constant 0 : i32
    return %arg0, %c0_i32 : i32, i32
  }
}

</mosaic_0001>

<bundles_post_ra>
// kernel: swiglu_pallas.1
= control target key start
LH: loop header
LB: loop body
LE: loop exit
PB: predicated region body
PF: predicated region fallthrough
CT: control target
= control target key end

     0   :  { %s327_s0 = inlined_call_operand.vmem [shape: f32[16,32], index: 0, kind: input, shape index: {}]   ;;  %s328_s1 = inlined_call_operand.vmem [shape: f32[32,64], index: 1, kind: input, shape index: {}]   ;;  %s329_s2 = inlined_call_operand.vmem [shape: f32[32,64], index: 2, kind: input, shape index: {}]   ;;  %s330_s3 = inlined_call_operand.vmem [shape: f32[64,32], index: 3, kind: input, shape index: {}]   ;;  %s331_s4 = inlined_call_operand.hbm [shape: f32[16,32], index: 4, kind: output, shape index: {}]  }
   0x1   :  { %v23_v0 = vld [vmem:[%s328_s1 + $0x18] sm:$0xff]  ;;  %v22_v1 = vld [vmem:[%s328_s1 + $0x10] sm:$0xff]  ;;  %v21_v2 = vld [vmem:[%s328_s1 + $0x8] sm:$0xff] }
   0x2   :  { %43 = vmatpush.msra.mxu0 %v23_v0  ;;  %v57_v3 = vld [vmem:[%s329_s2 + $0x18] sm:$0xff]  ;;  %v56_v4 = vld [vmem:[%s329_s2 + $0x10] sm:$0xff] }
   0x3   :  { %70 = vmatpush.msra.mxu1 %v57_v3 }
   0x4   :  { %44 = vmatpush.msra.mxu0 %v22_v1 }
   0x5   :  { %9 = vsyncpa [#allocation3], 0  ;;  %v20_v5 = vld [vmem:[%s328_s1] sm:$0xff]  ;;  %v55_v6 = vld [vmem:[%s329_s2 + $0x8] sm:$0xff]  ;;  %vm24_vm0 = vcmask 261120   ;;  %71 = vmatpush.msra.mxu1 %v56_v4  ;;  %vm131_vm5 = vcmask 523264  }
   0x6   :  { %45 = vmatpush.msra.mxu0 %v21_v2  ;;  %v18_v7 = vld [vmem:[%s327_s0] sm:$0xff]  ;;  %v19_v9 = vld [vmem:[%s327_s0 + $0x8] sm:$0xff]  ;;  %v130_v10 = vld [vmem:[%s330_s3 + $0x38] sm:$0xff]  ;;  %s169_s25 = sshll.u32 %s331_s4, 4  ;;  %s235_s26 = smov 128   ;;  %s170_s25 = int_to_ptr.hbm [resolvable:$true] %s169_s25 }
   0x7   :  { %v54_v8 = vld [vmem:[%s329_s2] sm:$0xff]  ;;  %72 = vmatpush.msra.mxu1 %v55_v6  ;;  %146 = vmatpush.msra.mxu2 %v130_v10  ;;  %v129_v11 = vld [vmem:[%s330_s3 + $0x30] sm:$0xff]  ;;  %v128_v12 = vld [vmem:[%s330_s3 + $0x28] sm:$0xff]  ;;  %s236_s27 = smov 8  }
   0x8   :  { %46 = vmatpush.msra.mxu0 %v20_v5  ;;  %189 = vmatpush.msra.mxu3 %v130_v10  ;;  %v127_v13 = vld [vmem:[%s330_s3 + $0x20] sm:$0xff]  ;;  %v126_v14 = vld [vmem:[%s330_s3 + $0x18] sm:$0xff]  ;;  %v125_v15 = vld [vmem:[%s330_s3 + $0x10] sm:$0xff] }
   0x9   :  { %181 = vmatmul.msk.f32.vlgmr.msra.gmra.mxu0 %vm24_vm0, %v18_v7  ;;  %73 = vmatpush.msra.mxu1 %v54_v8  ;;  %v124_v16 = vld [vmem:[%s330_s3 + $0x8] sm:$0xff]  ;;  %v123_v17 = vld [vmem:[%s330_s3] sm:$0xff]  ;;  %s234_s3 = smov [#allocation2]  }
   0xa   :  { %183 = vmatmul.msk.f32.vlgmr.msra.gmra.mxu1 %vm24_vm0, %v18_v7  ;;  %147 = vmatpush.msra.mxu2 %v129_v11  ;;  %s167_s22 = sshll.u32 %s234_s3, 4  ;;  %s168_s22 = int_to_ptr.vmem [resolvable:$true] %s167_s22 }
   0xb   :  { %190 = vmatpush.msra.mxu3 %v129_v11 }
   0xc   :  { %148 = vmatpush.msra.mxu2 %v128_v12 }
   0xd   :  { %191 = vmatpush.msra.mxu3 %v128_v12 }
   0xe   :  { %149 = vmatpush.msra.mxu2 %v127_v13 }
   0xf   :  { %192 = vmatpush.msra.mxu3 %v127_v13 }
  0x10   :  { %150 = vmatpush.msra.mxu2 %v126_v14 }
  0x11   :  { %182 = vmatmul.msk.f32.gmra.mxu0 %vm24_vm0, %v19_v9  ;;  %193 = vmatpush.msra.mxu3 %v126_v14 }
  0x12   :  { %184 = vmatmul.msk.f32.gmra.mxu1 %vm24_vm0, %v19_v9  ;;  %151 = vmatpush.msra.mxu2 %v125_v15 }
  0x13   :  { %194 = vmatpush.msra.mxu3 %v125_v15 }
  0x14   :  { %152 = vmatpush.msra.mxu2 %v124_v16 }
  0x15   :  { %195 = vmatpush.msra.mxu3 %v124_v16 }
  0x16   :  { %153 = vmatpush.msra.mxu2 %v123_v17 }
  0x17   :  { %196 = vmatpush.msra.mxu3 %v123_v17 }
  0x86   :  { %v48_v18 = vpop.f32.mrf.mxu0 }
  0x87   :  { %v185_v19 = vmul.f32 -1.442695, %v48_v18  ;;  %v75_v35 = vpop.f32.mrf.mxu1 }
  0x89   :  { %200 = vpow2.f32 %v185_v19 }
  0x8e   :  { %v51_v20 = vpop.f32.mrf.mxu0 }
  0x8f   :  { %v201_v21 = vpop.eup %200  ;;  %v186_v22 = vmul.f32 -1.442695, %v51_v20  ;;  %v78_v49 = vpop.f32.mrf.mxu1 }
  0x90   :  { %v87_v23 = vadd.f32 1.0, %v201_v21 }
  0x91   :  { %202 = vpow2.f32 %v186_v22 }
  0x92   :  { %204 = vrcp.f32 %v87_v23  ;;  %v100_v29 = vand.u32 2147483648, %v87_v23  ;;  %v98_v31 = vand.u32 2147483647, %v87_v23  ;;  %vm94_vm2 = vweird.f32 %v87_v23 }
  0x94   :  { %v101_v34 = vor.u32 1.1754944e-38, %v100_v29  ;;  %vm99_vm4 = vcmp.eq.f32.partialorder %v98_v31, 8.507059e+37 }
  0x97   :  { %v203_v24 = vpop.eup %202 }
  0x98   :  { %v205_v25 = vpop.eup %204  ;;  %v88_v26 = vadd.f32 1.0, %v203_v24 }
  0x99   :  { %v90_v27 = vmul.f32 %v205_v25, %v87_v23  ;;  %vm95_vm1 = vweird.f32 %v205_v25 }
  0x9a   :  { %206 = vrcp.f32 %v88_v26  ;;  %vm96_vm3 = vmor %vm94_vm2, %vm95_vm1  ;;  %v115_v41 = vand.u32 2147483648, %v88_v26  ;;  %v113_v43 = vand.u32 2147483647, %v88_v26  ;;  %vm109_vm7 = vweird.f32 %v88_v26 }
  0x9b   :  { %v91_v28 = vsub.f32 1.0, %v90_v27 }
  0x9c   :  { %v116_v46 = vor.u32 1.1754944e-38, %v115_v41  ;;  %vm114_vm9 = vcmp.eq.f32.partialorder %v113_v43, 8.507059e+37 }
  0x9d   :  { %v92_v30 = vmul.f32 %v205_v25, %v91_v28 }
  0x9f   :  { %v93_v32 = vadd.f32 %v205_v25, %v92_v30 }
  0xa0   :  { %v207_v33 = vpop.eup %206 }
  0xa1   :  { %v97_v36 = vsel %vm96_vm3, %v205_v25, %v93_v32  ;;  %v105_v37 = vmul.f32 %v207_v33, %v88_v26  ;;  %vm110_vm6 = vweird.f32 %v207_v33 }
  0xa2   :  { %v102_v38 = vsel %vm99_vm4, %v101_v34, %v97_v36  ;;  %vm111_vm8 = vmor %vm109_vm7, %vm110_vm6 }
  0xa3   :  { %v119_v39 = vmul.f32 %v102_v38, %v48_v18  ;;  %v106_v40 = vsub.f32 1.0, %v105_v37 }
  0xa5   :  { %v107_v42 = vmul.f32 %v207_v33, %v106_v40  ;;  %v121_v44 = vmul.f32 %v119_v39, %v75_v35 }
  0xa7   :  { %v108_v45 = vadd.f32 %v207_v33, %v107_v42  ;;  %187 = vmatmul.msk.f32.vlgmr.msra.gmra.mxu2 %vm131_vm5, %v121_v44 }
  0xa9   :  { %v112_v47 = vsel %vm111_vm8, %v207_v33, %v108_v45 }
  0xaa   :  { %v117_v48 = vsel %vm114_vm9, %v116_v46, %v112_v47 }
  0xab   :  { %v120_v50 = vmul.f32 %v117_v48, %v51_v20 }
  0xad   :  { %v122_v51 = vmul.f32 %v120_v50, %v78_v49 }
  0xaf   :  { %188 = vmatmul.msk.f32.vlgmr.msra.gmra.mxu3 %vm131_vm5, %v122_v51 }
 0x12a   :  { %v155_v52 = vpop.f32.mrf.mxu2 }
 0x12b   :  { %161 = vst.msk [vmem:[#allocation2] sm:$0xff] %vm24_vm0, %v155_v52 }
 0x132   :  { %v158_v53 = vpop.f32.mrf.mxu3 }
 0x133   :  { %162 = vst.msk [vmem:[#allocation2 + $0x8] sm:$0xff] %vm24_vm0, %v158_v53 }
 0x134   :  { %175 = dma.vmem_to_hbm [thread:$0]  %s168_s22, 256, %s170_s25, [#allocation3], %s235_s26, %s235_s26, %s236_s27  }
 0x135   :  { %232 = dma.done.wait [#allocation3], 256  }
 0x136   :  { %233 = vsyncadd [#allocation3], 4294967040 }
 0x137   :  { %180 = vsyncpa [#allocation3], 1 }

</bundles_post_ra>
